<compile_context>
chip_gen: v7x
topology: tpu7x:2x2x1
jax: 0.10.0
libtpu: 0.0.40
codegen_flags: <defaults>
</compile_context>

<pallas_src>
import functools

import jax
import jax.numpy as jnp
from jax.experimental import pallas as pl
from jax.experimental.pallas import tpu as pltpu


_FUSED_MAX_ROWS = 512          # max padded table rows for the one-hot fused path
_VMEM_DATA_BUDGET = 20 * 2**20  # per-step data budget (v7x: 64 MiB physical VMEM)


def _round_up(x, m):
    return ((int(x) + m - 1) // m) * m


def _pick_tile(E, tile_e, per_lane_bytes):
    """Largest lane-tile that fits the VMEM budget; prefers >=2 grid steps."""
    e_round = _round_up(max(int(E), 1), 128)
    tile = max(128, min(int(tile_e), e_round))
    cap = max(128, (_VMEM_DATA_BUDGET // max(int(per_lane_bytes), 1)) // 128 * 128)
    tile = _round_up(min(tile, cap), 128)
    # v7x has 2 TensorCores; with dimension_semantics=("parallel",) a >=2 step
    # grid lets both cores take edge tiles.  Only split when each half still
    # amortizes the ~0.35us per-step overhead.
    if pl.cdiv(e_round, tile) == 1 and e_round >= 1024:
        tile = _round_up(pl.cdiv(e_round, 2), 128)
    return tile


def _vmem_limit(per_lane_bytes, tile):
    est = 2 * int(per_lane_bytes) * int(tile) + (1 << 20)
    # Never drop below the default scoped limits; never exceed v7x physical.
    return int(min(48 * 2**20, max(32 * 2**20, est)))


# --------------------------------------------------------------------------
# Fused-gather kernel: indices in, scores out.
# --------------------------------------------------------------------------
def _edge_decoder_fused_kernel(row_ref, col_ref, au_ref, am_ref, b1_ref,
                               w2_ref, b2_ref, o_ref):
    # row_ref : (1, TE)  int32   user index per edge
    # col_ref : (1, TE)  int32   movie index per edge
    # au_ref  : (H, NU)  f32     W1_user  @ Z_user^T   (VMEM-resident)
    # am_ref  : (H, NM)  f32     W1_movie @ Z_movie^T  (VMEM-resident)
    # b1_ref  : (H, 1)   f32
    # w2_ref  : (H, 1)   f32
    # b2_ref  : (1,)     f32     SMEM scalar
    # o_ref   : (1, TE)  f32     lane-dense scores
    nu = au_ref.shape[1]
    nm = am_ref.shape[1]
    te = row_ref.shape[1]

    # In-kernel gather as a one-hot MXU contraction (exact column selection).
    oh_u = jnp.where(
        jax.lax.broadcasted_iota(jnp.int32, (nu, te), 0) == row_ref[...],
        1.0, 0.0).astype(jnp.float32)
    h = jnp.dot(au_ref[...], oh_u, preferred_element_type=jnp.float32)

    oh_m = jnp.where(
        jax.lax.broadcasted_iota(jnp.int32, (nm, te), 0) == col_ref[...],
        1.0, 0.0).astype(jnp.float32)
    h = h + jnp.dot(am_ref[...], oh_m, preferred_element_type=jnp.float32)

    h = jnp.maximum(h + b1_ref[...], 0.0)                      # f32 bias+relu
    # lin2: VPU broadcast-mul + sublane (XLU) reduce -> lane-dense (1, TE).
    out = jnp.sum(h * w2_ref[...], axis=0, keepdims=True) + b2_ref[0]
    o_ref[...] = out.astype(o_ref.dtype)


def _edge_decoder_fused(z_user, z_movie, row, col, params, tile_e):
    E = row.shape[0]
    H = z_user.shape[1]
    nu, nm = z_user.shape[0], z_movie.shape[0]
    nu_pad = _round_up(nu, 128)
    nm_pad = _round_up(nm, 128)

    f32 = jnp.float32
    hi = jax.lax.Precision.HIGHEST
    w1 = params["w1"].astype(f32)                               # (H, 2H)
    # Fold lin1 into the per-entity tables once (gather commutes with a linear
    # map); O(H^2 * N) flops total, negligible vs. E.
    au = jnp.dot(w1[:, :H], z_user.astype(f32).T, precision=hi)   # (H, nu)
    am = jnp.dot(w1[:, H:], z_movie.astype(f32).T, precision=hi)  # (H, nm)
    au = jnp.pad(au, ((0, 0), (0, nu_pad - nu)))                  # zero cols
    am = jnp.pad(am, ((0, 0), (0, nm_pad - nm)))

    b1 = params["b1"].reshape(H, 1).astype(f32)
    w2 = params["w2"].reshape(H, 1).astype(f32)
    b2 = params["b2"].reshape(1).astype(f32)

    # Per-output-lane VMEM estimate: double-buffered index blocks + output,
    # plus in-kernel one-hot / iota / h intermediates (single-buffered).
    per_lane = 2 * 8 + 2 * 4 + 12 * max(nu_pad, nm_pad) + 4 * H + 64
    tile = _pick_tile(E, tile_e, per_lane)
    e_pad = pl.cdiv(E, tile) * tile

    # Pad ONLY the tiny int32 index vectors (index 0 is always valid).
    row_p = jnp.pad(row.astype(jnp.int32), (0, e_pad - E)).reshape(1, e_pad)
    col_p = jnp.pad(col.astype(jnp.int32), (0, e_pad - E)).reshape(1, e_pad)

    out = pl.pallas_call(
        _edge_decoder_fused_kernel,
        out_shape=jax.ShapeDtypeStruct((1, e_pad), f32),
        grid=(e_pad // tile,),
        in_specs=[
            pl.BlockSpec((1, tile), lambda i: (0, i)),            # row tile
            pl.BlockSpec((1, tile), lambda i: (0, i)),            # col tile
            pl.BlockSpec((H, nu_pad), lambda i: (0, 0)),          # Au (resident)
            pl.BlockSpec((H, nm_pad), lambda i: (0, 0)),          # Am (resident)
            pl.BlockSpec((H, 1), lambda i: (0, 0)),               # b1
            pl.BlockSpec((H, 1), lambda i: (0, 0)),               # w2 column
            pl.BlockSpec(memory_space=pltpu.MemorySpace.SMEM),    # b2 scalar
        ],
        out_specs=pl.BlockSpec((1, tile), lambda i: (0, i)),      # lane-dense
        compiler_params=pltpu.CompilerParams(
            dimension_semantics=("parallel",),
            vmem_limit_bytes=_vmem_limit(per_lane, tile),
        ),
    )(row_p, col_p, au, am, b1, w2, b2)

    return out.reshape(-1)[:E]                 # matches torch z.view(-1)


# --------------------------------------------------------------------------
# Streaming fallback kernel (entity tables too large for VMEM residency).
# --------------------------------------------------------------------------
def _edge_decoder_stream_kernel(zu_ref, zm_ref, w1u_ref, w1m_ref, b1_ref,
                                w2_ref, b2_ref, o_ref):
    # zu_ref / zm_ref : (H, TE) bf16 gathered embeddings, features on sublanes
    # Two K=H dots kept separate: kernel is HBM-bound, MXU has slack.
    h = jnp.dot(w1u_ref[...], zu_ref[...], preferred_element_type=jnp.float32)
    h = h + jnp.dot(w1m_ref[...], zm_ref[...],
                    preferred_element_type=jnp.float32)
    h = jnp.maximum(h + b1_ref[...], 0.0)                        # f32 relu
    out = jnp.sum(h * w2_ref[...], axis=0, keepdims=True) + b2_ref[0]
    o_ref[...] = out.astype(o_ref.dtype)


def _edge_decoder_streaming(z_user, z_movie, row, col, params, tile_e):
    E = row.shape[0]
    H = z_user.shape[1]

    per_lane = 12 * H + 48          # 2 bf16 streams x2 buf + f32 out + f32 h
    tile = _pick_tile(E, tile_e, per_lane)
    e_pad = pl.cdiv(E, tile) * tile

    # Pad the tiny index vectors, then gather ROWS (contiguous) and transpose
    # once -- no strided column gather, no pad of (H, E) activations.
    row_p = jnp.pad(row.astype(jnp.int32), (0, e_pad - E))
    col_p = jnp.pad(col.astype(jnp.int32), (0, e_pad - E))
    # NOTE: bf16 streams deviate from f32 torch by ~1e-2 relative on logits;
    # kept for bandwidth on this HBM-bound path (documented for users).
    zuT = jnp.take(z_user, row_p, axis=0).astype(jnp.bfloat16).T   # (H, e_pad)
    zmT = jnp.take(z_movie, col_p, axis=0).astype(jnp.bfloat16).T  # (H, e_pad)

    w1 = params["w1"]
    w1u = w1[:, :H].astype(jnp.bfloat16)
    w1m = w1[:, H:].astype(jnp.bfloat16)
    b1 = params["b1"].reshape(H, 1).astype(jnp.float32)
    w2 = params["w2"].reshape(H, 1).astype(jnp.float32)
    b2 = params["b2"].reshape(1).astype(jnp.float32)

    out = pl.pallas_call(
        _edge_decoder_stream_kernel,
        out_shape=jax.ShapeDtypeStruct((1, e_pad), jnp.float32),
        grid=(e_pad // tile,),
        in_specs=[
            pl.BlockSpec((H, tile), lambda i: (0, i)),            # zu^T tile
            pl.BlockSpec((H, tile), lambda i: (0, i)),            # zm^T tile
            pl.BlockSpec((H, H), lambda i: (0, 0)),               # W1 user half
            pl.BlockSpec((H, H), lambda i: (0, 0)),               # W1 movie half
            pl.BlockSpec((H, 1), lambda i: (0, 0)),               # b1
            pl.BlockSpec((H, 1), lambda i: (0, 0)),               # w2 column
            pl.BlockSpec(memory_space=pltpu.MemorySpace.SMEM),    # b2 scalar
        ],
        out_specs=pl.BlockSpec((1, tile), lambda i: (0, i)),
        compiler_params=pltpu.CompilerParams(
            dimension_semantics=("parallel",),
            vmem_limit_bytes=_vmem_limit(per_lane, tile),
        ),
    )(zuT, zmT, w1u, w1m, b1, w2, b2)

    return out.reshape(-1)[:E]


# --------------------------------------------------------------------------
# Public entry point.
# --------------------------------------------------------------------------
@functools.partial(jax.jit, static_argnames=("tile_e", "mode"))
def edge_decoder_forward(z_user, z_movie, edge_label_index, params,
                         tile_e=None, mode="auto"):
    """Pallas implementation of EdgeDecoder.forward.

    z_user : (N_user, H) f32, z_movie : (N_movie, H) f32,
    edge_label_index : (2, E) int32,
    params : dict with w1 (H, 2H), b1 (H,), w2 (1, H), b2 (1,).
    Returns (E,) f32, matching `self.lin2(relu(self.lin1(cat))).view(-1)`.
    """
    row = edge_label_index[0]
    col = edge_label_index[1]
    nu_pad = _round_up(z_user.shape[0], 128)
    nm_pad = _round_up(z_movie.shape[0], 128)

    if mode == "fused":
        use_fused = True
    elif mode == "stream":
        use_fused = False
    else:  # auto: fused gather only while tables / one-hot fit comfortably
        use_fused = max(nu_pad, nm_pad) <= _FUSED_MAX_ROWS

    if use_fused:
        return _edge_decoder_fused(z_user, z_movie, row, col, params,
                                   tile_e=4096 if tile_e is None else tile_e)
    return _edge_decoder_streaming(z_user, z_movie, row, col, params,
                                   tile_e=8192 if tile_e is None else tile_e)


def _init_params(key, hidden_channels):
    """Deterministic init mimicking torch.nn.Linear default U(+/- 1/sqrt(fan_in))."""
    H = hidden_channels
    k1, k2, k3, k4 = jax.random.split(key, 4)
    bound1 = 1.0 / jnp.sqrt(2.0 * H)
    bound2 = 1.0 / jnp.sqrt(1.0 * H)
    return {
        "w1": jax.random.uniform(k1, (H, 2 * H), jnp.float32, -bound1, bound1),
        "b1": jax.random.uniform(k2, (H,), jnp.float32, -bound1, bound1),
        "w2": jax.random.uniform(k3, (1, H), jnp.float32, -bound2, bound2),
        "b2": jax.random.uniform(k4, (1,), jnp.float32, -bound2, bound2),
    }


def _reference(z_user, z_movie, edge_label_index, params):
    """Faithful f32 reference of the PyTorch module (highest-precision dots)."""
    row, col = edge_label_index
    z = jnp.concatenate([z_user[row], z_movie[col]], axis=-1)
    hi = jax.lax.Precision.HIGHEST
    h = jnp.dot(z, params["w1"].T, precision=hi) + params["b1"]
    h = jnp.maximum(h, 0.0)
    out = jnp.dot(h, params["w2"].T, precision=hi) + params["b2"]
    return out.reshape(-1)


if __name__ == "__main__":
    H = 32            # hidden_channels
    N_USER = 16
    N_MOVIE = 24
    E = 200           # deliberately NOT a tile multiple -> exercises index pad

    key = jax.random.PRNGKey(0)
    k_zu, k_zm, k_row, k_col, k_par = jax.random.split(key, 5)

    z_user = jax.random.normal(k_zu, (N_USER, H), jnp.float32)
    z_movie = jax.random.normal(k_zm, (N_MOVIE, H), jnp.float32)
    row = jax.random.randint(k_row, (E,), 0, N_USER, jnp.int32)
    col = jax.random.randint(k_col, (E,), 0, N_MOVIE, jnp.int32)
    edge_label_index = jnp.stack([row, col], axis=0)              # (2, E)

    params = _init_params(k_par, H)
    ref = _reference(z_user, z_movie, edge_label_index, params)

    # Primary path: fused in-kernel gather, f32 end-to-end.  Tolerance covers
    # the per-generation f32 MXU pass decomposition.
    out_fused = jax.block_until_ready(
        edge_decoder_forward(z_user, z_movie, edge_label_index, params))
    assert out_fused.shape == (E,), out_fused.shape
    err_fused = float(jnp.max(jnp.abs(out_fused - ref)))
    assert jnp.allclose(out_fused, ref, atol=1e-2, rtol=1e-2), err_fused

    # Fallback path: bf16 streaming (used when entity tables are large).
    out_stream = jax.block_until_ready(
        edge_decoder_forward(z_user, z_movie, edge_label_index, params,
                             mode="stream"))
    assert out_stream.shape == (E,), out_stream.shape
    err_stream = float(jnp.max(jnp.abs(out_stream - ref)))
    assert jnp.allclose(out_stream, ref, atol=3e-2, rtol=3e-2), err_stream

    print("KERNEL_OK")
</pallas_src>

<mosaic_0001>
module attributes {stable_mosaic.version = 11 : i64} {
  func.func @_edge_decoder_fused_kernel(%arg0: i32, %arg1: memref<1x256xi32, #tpu.memory_space<vmem>>, %arg2: memref<1x256xi32, #tpu.memory_space<vmem>>, %arg3: memref<32x128xf32, #tpu.memory_space<vmem>>, %arg4: memref<32x128xf32, #tpu.memory_space<vmem>>, %arg5: memref<32x1xf32, #tpu.memory_space<vmem>>, %arg6: memref<32x1xf32, #tpu.memory_space<vmem>>, %arg7: memref<1xf32, #tpu.memory_space<smem>>, %arg8: memref<1x256xf32, #tpu.memory_space<vmem>>) attributes {dimension_semantics = [#tpu.dimension_semantics<parallel>], iteration_bounds = array<i64: 1>, scalar_prefetch = 0 : i64, scratch_operands = 0 : i64, tpu.core_type = #tpu.core_type<tc>, window_params = [{transform_indices = @transform_0, window_bounds = array<i64: 1, 256>}, {transform_indices = @transform_1, window_bounds = array<i64: 1, 256>}, {pipeline_mode = #tpu.pipeline_mode<synchronous>, transform_indices = @transform_2, window_bounds = array<i64: 32, 128>}, {pipeline_mode = #tpu.pipeline_mode<synchronous>, transform_indices = @transform_3, window_bounds = array<i64: 32, 128>}, {pipeline_mode = #tpu.pipeline_mode<synchronous>, transform_indices = @transform_4, window_bounds = array<i64: 32, 1>}, {pipeline_mode = #tpu.pipeline_mode<synchronous>, transform_indices = @transform_5, window_bounds = array<i64: 32, 1>}, {transform_indices = @transform_6, window_bounds = array<i64: 1>}, {transform_indices = @transform_7, window_bounds = array<i64: 1, 256>}]} {
    %0 = tpu.iota {dimensions = array<i32: 0>} : vector<128x256xi32>
    %c0 = arith.constant 0 : index
    %c0_0 = arith.constant 0 : index
    %1 = vector.load %arg1[%c0, %c0_0] : memref<1x256xi32, #tpu.memory_space<vmem>>, vector<1x256xi32>
    %2 = vector.broadcast %1 : vector<1x256xi32> to vector<128x256xi32>
    %3 = arith.cmpi eq, %0, %2 : vector<128x256xi32>
    %cst = arith.constant 1.000000e+00 : f32
    %cst_1 = arith.constant 0.000000e+00 : f32
    %4 = vector.broadcast %cst : f32 to vector<128x256xf32>
    %5 = vector.broadcast %cst_1 : f32 to vector<128x256xf32>
    %6 = arith.select %3, %4, %5 : vector<128x256xi1>, vector<128x256xf32>
    %c0_2 = arith.constant 0 : index
    %c0_3 = arith.constant 0 : index
    %7 = vector.load %arg3[%c0_2, %c0_3] : memref<32x128xf32, #tpu.memory_space<vmem>>, vector<32x128xf32>
    %cst_4 = arith.constant dense<0.000000e+00> : vector<32x256xf32>
    %8 = tpu.matmul %7, %6, %cst_4 {dimension_numbers = #tpu.dot_dimension_numbers<[1], [0], [0], [1], [0, 0, 1, 1], [], []>} : vector<32x128xf32>, vector<128x256xf32>, vector<32x256xf32> -> vector<32x256xf32>
    %9 = tpu.iota {dimensions = array<i32: 0>} : vector<128x256xi32>
    %c0_5 = arith.constant 0 : index
    %c0_6 = arith.constant 0 : index
    %10 = vector.load %arg2[%c0_5, %c0_6] : memref<1x256xi32, #tpu.memory_space<vmem>>, vector<1x256xi32>
    %11 = vector.broadcast %10 : vector<1x256xi32> to vector<128x256xi32>
    %12 = arith.cmpi eq, %9, %11 : vector<128x256xi32>
    %cst_7 = arith.constant 1.000000e+00 : f32
    %cst_8 = arith.constant 0.000000e+00 : f32
    %13 = vector.broadcast %cst_7 : f32 to vector<128x256xf32>
    %14 = vector.broadcast %cst_8 : f32 to vector<128x256xf32>
    %15 = arith.select %12, %13, %14 : vector<128x256xi1>, vector<128x256xf32>
    %c0_9 = arith.constant 0 : index
    %c0_10 = arith.constant 0 : index
    %16 = vector.load %arg4[%c0_9, %c0_10] : memref<32x128xf32, #tpu.memory_space<vmem>>, vector<32x128xf32>
    %cst_11 = arith.constant dense<0.000000e+00> : vector<32x256xf32>
    %17 = tpu.matmul %16, %15, %cst_11 {dimension_numbers = #tpu.dot_dimension_numbers<[1], [0], [0], [1], [0, 0, 1, 1], [], []>} : vector<32x128xf32>, vector<128x256xf32>, vector<32x256xf32> -> vector<32x256xf32>
    %18 = arith.addf %8, %17 : vector<32x256xf32>
    %c0_12 = arith.constant 0 : index
    %c0_13 = arith.constant 0 : index
    %19 = vector.load %arg5[%c0_12, %c0_13] : memref<32x1xf32, #tpu.memory_space<vmem>>, vector<32x1xf32>
    %20 = vector.broadcast %19 : vector<32x1xf32> to vector<32x256xf32>
    %21 = arith.addf %18, %20 : vector<32x256xf32>
    %cst_14 = arith.constant 0.000000e+00 : f32
    %22 = vector.broadcast %cst_14 : f32 to vector<32x256xf32>
    %23 = arith.maximumf %21, %22 : vector<32x256xf32>
    %c0_15 = arith.constant 0 : index
    %c0_16 = arith.constant 0 : index
    %24 = vector.load %arg6[%c0_15, %c0_16] : memref<32x1xf32, #tpu.memory_space<vmem>>, vector<32x1xf32>
    %25 = vector.broadcast %24 : vector<32x1xf32> to vector<32x256xf32>
    %26 = arith.mulf %23, %25 : vector<32x256xf32>
    %cst_17 = arith.constant dense<0.000000e+00> : vector<256xf32>
    %27 = vector.multi_reduction <add>, %26, %cst_17 [0] : vector<32x256xf32> to vector<256xf32>
    %28 = vector.shape_cast %27 : vector<256xf32> to vector<1x256xf32>
    %c0_18 = arith.constant 0 : index
    %29 = memref.load %arg7[%c0_18] : memref<1xf32, #tpu.memory_space<smem>>
    %30 = vector.broadcast %29 : f32 to vector<1x256xf32>
    %31 = arith.addf %28, %30 : vector<1x256xf32>
    %c0_19 = arith.constant 0 : index
    %c0_20 = arith.constant 0 : index
    %32 = vector.load %arg8[%c0_19, %c0_20] : memref<1x256xf32, #tpu.memory_space<vmem>>, vector<1x256xf32>
    tpu.vector_store %arg8[%c0_19, %c0_20], %31 {strides = array<i32>} : memref<1x256xf32, #tpu.memory_space<vmem>>, vector<1x256xf32>,
    return
  }
  func.func @transform_0(%arg0: i32) -> (i32, i32) {
    %c0_i32 = arith.constant 0 : i32
    %c0_i32_0 = arith.constant 0 : i32
    return %c0_i32, %arg0 : i32, i32
  }
  func.func @transform_1(%arg0: i32) -> (i32, i32) {
    %c0_i32 = arith.constant 0 : i32
    %c0_i32_0 = arith.constant 0 : i32
    return %c0_i32, %arg0 : i32, i32
  }
  func.func @transform_2(%arg0: i32) -> (i32, i32) {
    %c0_i32 = arith.constant 0 : i32
    %c0_i32_0 = arith.constant 0 : i32
    %c0_i32_1 = arith.constant 0 : i32
    return %c0_i32, %c0_i32_0 : i32, i32
  }
  func.func @transform_3(%arg0: i32) -> (i32, i32) {
    %c0_i32 = arith.constant 0 : i32
    %c0_i32_0 = arith.constant 0 : i32
    %c0_i32_1 = arith.constant 0 : i32
    return %c0_i32, %c0_i32_0 : i32, i32
  }
  func.func @transform_4(%arg0: i32) -> (i32, i32) {
    %c0_i32 = arith.constant 0 : i32
    %c0_i32_0 = arith.constant 0 : i32
    %c0_i32_1 = arith.constant 0 : i32
    return %c0_i32, %c0_i32_0 : i32, i32
  }
  func.func @transform_5(%arg0: i32) -> (i32, i32) {
    %c0_i32 = arith.constant 0 : i32
    %c0_i32_0 = arith.constant 0 : i32
    %c0_i32_1 = arith.constant 0 : i32
    return %c0_i32, %c0_i32_0 : i32, i32
  }
  func.func @transform_6(%arg0: i32) -> i32 {
    %c0_i32 = arith.constant 0 : i32
    %c0_i32_0 = arith.constant 0 : i32
    return %c0_i32 : i32
  }
  func.func @transform_7(%arg0: i32) -> (i32, i32) {
    %c0_i32 = arith.constant 0 : i32
    %c0_i32_0 = arith.constant 0 : i32
    return %c0_i32, %arg0 : i32, i32
  }
}

</mosaic_0001>

<bundles_post_ra>
// kernel: edge_decoder_forward.1
= control target key start
LH: loop header
LB: loop body
LE: loop exit
PB: predicated region body
PF: predicated region fallthrough
CT: control target
= control target key end

     0   :  { %v28_v0 = vlaneseq  ;;  %v675_v2 = vmov 0.0   ;;  %v676_v5 = vmov 0   ;;  %s946_s0 = inlined_call_operand.vmem [shape: s32[1,256], index: 0, kind: input, shape index: {}]   ;;  %s947_s1 = inlined_call_operand.vmem [shape: s32[1,256], index: 1, kind: input, shape index: {}]   ;;  %s948_s2 = inlined_call_operand.vmem [shape: f32[32,128], index: 2, kind: input, shape index: {}]   ;;  %s949_s3 = inlined_call_operand.vmem [shape: f32[32,128], index: 3, kind: input, shape index: {}]   ;;  %s950_s4 = inlined_call_operand.vmem [shape: f32[32,1], index: 4, kind: input, shape index: {}]   ;;  %s951_s5 = inlined_call_operand.vmem [shape: f32[32,1], index: 5, kind: input, shape index: {}]   ;;  %s952_s6 = inlined_call_operand.<no memory space> [shape: f32[1], index: 6, kind: input, shape index: {}]   ;;  %s953_s7 = inlined_call_operand.hbm [shape: f32[1,256], index: 7, kind: output, shape index: {}]  }
   0x1   :  { %263 = vmatprep.mubr.f32.mxu1 %v675_v2  ;;  %352 = vmatprep.mubr.f32.mxu0 %v675_v2  ;;  %v122_v3 = vld [vmem:[%s947_s1] sm:$0x3]  ;;  %v379_v10 = vld [vmem:[%s950_s4 + $0x10] sm:$0xff]  ;;  %v378_v13 = vld [vmem:[%s950_s4 + $0x8] sm:$0xff] }
   0x2   :  { %v721_v1 = vshrl.u32 %v28_v0, 7  ;;  %v45_v4 = vld [vmem:[%s946_s0] sm:$0x3]  ;;  %649 = vset.pattern.permute.xlu0 %v676_v5  ;;  %650 = vset.pattern.permute.xlu1 %v676_v5  ;;  %v380_v18 = vld [vmem:[%s950_s4 + $0x18] sm:$0xff] }
   0x3   :  { %v377_v6 = vld [vmem:[%s950_s4] sm:$0xff]  ;;  %393 = vperm.xlu1 %650, %v379_v10  }
   0x4   :  { %v30_v7 = vadd.s32 8, %v721_v1  ;;  %v52_v8 = vsub.s32 1, %v721_v1  ;;  %v48_v9 = vsub.s32 0, %v721_v1  ;;  %383 = vperm.xlu0 %649, %v377_v6   ;;  %v31_v11 = vadd.s32 16, %v721_v1 }
   0x5   :  { %v32_v12 = vadd.s32 24, %v721_v1 }
   0x6   :  { %v745_v14 = vrot.slane %v122_v3, %v52_v8  ;;  %v747_v15 = vrot.slane %v45_v4, %v52_v8  ;;  %v749_v16 = vrot.slane %v122_v3, %v48_v9  ;;  %v751_v17 = vrot.slane %v45_v4, %v48_v9 }
   0x7   :  { %13 = vsyncpa [#allocation4], 0  ;;  %398 = vperm.xlu1 %650, %v380_v18   ;;  %v677_v19 = vmov 1.0|1.0   ;;  %v33_v20 = vadd.s32 32, %v721_v1  ;;  %v34_v21 = vadd.s32 40, %v721_v1 }
   0x8   :  { %vm132_vm0 = vcmp.eq.s32.totalorder %v721_v1, %v745_v14  ;;  %vm134_vm1 = vcmp.eq.s32.totalorder %v30_v7, %v745_v14  ;;  %vm55_vm2 = vcmp.eq.s32.totalorder %v721_v1, %v747_v15  ;;  %vm57_vm3 = vcmp.eq.s32.totalorder %v30_v7, %v747_v15  ;;  %388 = vperm.xlu0 %649, %v378_v13   ;;  %v417_v24 = vld [vmem:[%s951_s5] sm:$0xff]  ;;  %v418_v25 = vld [vmem:[%s951_s5 + $0x8] sm:$0xff]  ;;  %v419_v28 = vld [vmem:[%s951_s5 + $0x10] sm:$0xff]  ;;  %s679_s8 = smov [#allocation3]  }
   0x9   :  { %vm572_vm4 = vmpackc.low %vm134_vm1, %vm132_vm0  ;;  %vm131_vm5 = vcmp.eq.s32.totalorder %v721_v1, %v749_v16  ;;  %vm133_vm6 = vcmp.eq.s32.totalorder %v30_v7, %v749_v16  ;;  %vm54_vm7 = vcmp.eq.s32.totalorder %v721_v1, %v751_v17  ;;  %vm56_vm8 = vcmp.eq.s32.totalorder %v30_v7, %v751_v17  ;;  %v420_v29 = vld [vmem:[%s951_s5 + $0x18] sm:$0xff]  ;;  %v195_v36 = vld [vmem:[%s949_s3] sm:$0xff]  ;;  %s500_s9 = sshll.u32 %s679_s8, 4  ;;  %s501_s9 = int_to_ptr.vmem [resolvable:$true] %s500_s9 }
   0xa   :  { %573 = vmatprep.subr.msk.bf16.mxu1 %vm572_vm4, %v677_v19  ;;  %vm604_vm9 = vmpackc.low %vm57_vm3, %vm55_vm2  ;;  %vm136_vm10 = vcmp.eq.s32.totalorder %v31_v11, %v745_v14  ;;  %vm138_vm11 = vcmp.eq.s32.totalorder %v32_v12, %v745_v14  ;;  %vm59_vm13 = vcmp.eq.s32.totalorder %v31_v11, %v747_v15  ;;  %vm61_vm14 = vcmp.eq.s32.totalorder %v32_v12, %v747_v15  ;;  %v118_v37 = vld [vmem:[%s948_s2] sm:$0xff]  ;;  %v196_v38 = vld [vmem:[%s949_s3 + $0x8] sm:$0xff]  ;;  %s651_s10 = scalar_lea.vmem %s501_s9, 32  ;;  %p656_p1 = scmp.lt.s32.totalorder %s501_s9, %s501_s9 }
   0xb   :  { %605 = vmatprep.subr.msk.bf16.mxu0 %vm604_vm9, %v677_v19  ;;  %vm574_vm12 = vmpackc.low %vm133_vm6, %vm131_vm5  ;;  %vm135_vm0 = vcmp.eq.s32.totalorder %v31_v11, %v749_v16  ;;  %vm137_vm1 = vcmp.eq.s32.totalorder %v32_v12, %v749_v16  ;;  %vm58_vm3 = vcmp.eq.s32.totalorder %v31_v11, %v751_v17  ;;  %vm60_vm4 = vcmp.eq.s32.totalorder %v32_v12, %v751_v17  ;;  %v119_v39 = vld [vmem:[%s948_s2 + $0x8] sm:$0xff]  ;;  %v197_v40 = vld [vmem:[%s949_s3 + $0x10] sm:$0xff]  ;;  %p652_p0 = scmp.ne.s32.totalorder %s501_s9, %s651_s10  ;;  %p657_p2 = scmp.lt.s32.totalorder %s651_s10, %s651_s10 }
   0xc   :  { %575 = vmatpush1.bf16.msk.msra.mxu1 %vm574_vm12, %v677_v19  ;;  %vm606_vm15 = vmpackc.low %vm56_vm8, %vm54_vm7  ;;  %vm140_vm6 = vcmp.eq.s32.totalorder %v33_v20, %v745_v14  ;;  %vm142_vm9 = vcmp.eq.s32.totalorder %v34_v21, %v745_v14  ;;  %v35_v22 = vadd.s32 48, %v721_v1  ;;  %v36_v23 = vadd.s32 56, %v721_v1  ;;  %423 = vperm.xlu0 %649, %v417_v24   ;;  %v120_v41 = vld [vmem:[%s948_s2 + $0x10] sm:$0xff]  ;;  %v198_v42 = vld [vmem:[%s949_s3 + $0x18] sm:$0xff] }
   0xd   :  { %607 = vmatpush1.bf16.msk.msra.mxu0 %vm606_vm15, %v677_v19  ;;  %vm576_vm2 = vmpackc.low %vm138_vm11, %vm136_vm10  ;;  %vm63_vm8 = vcmp.eq.s32.totalorder %v33_v20, %v747_v15  ;;  %vm65_vm10 = vcmp.eq.s32.totalorder %v34_v21, %v747_v15  ;;  %vm139_vm12 = vcmp.eq.s32.totalorder %v33_v20, %v749_v16  ;;  %vm62_vm15 = vcmp.eq.s32.totalorder %v33_v20, %v751_v17  ;;  %v121_v43 = vld [vmem:[%s948_s2 + $0x18] sm:$0xff]  ;;  %p658_p3 = por %p657_p2, %p656_p1 }
   0xe   :  { %577 = vmatprep.subr.msk.bf16.mxu1 %vm576_vm2, %v677_v19  ;;  %vm608_vm5 = vmpackc.low %vm61_vm14, %vm59_vm13  ;;  %vm141_vm13 = vcmp.eq.s32.totalorder %v34_v21, %v749_v16  ;;  %vm144_vm2 = vcmp.eq.s32.totalorder %v35_v22, %v745_v14  ;;  %v37_v26 = vadd.s32 64, %v721_v1  ;;  %v38_v27 = vadd.s32 72, %v721_v1  ;;  %428 = vperm.xlu1 %650, %v418_v25  }
   0xf   :  { %609 = vmatprep.subr.msk.bf16.mxu0 %vm608_vm5, %v677_v19  ;;  %vm578_vm7 = vmpackc.low %vm137_vm1, %vm135_vm0  ;;  %vm64_vm0 = vcmp.eq.s32.totalorder %v34_v21, %v751_v17  ;;  %vm67_vm5 = vcmp.eq.s32.totalorder %v35_v22, %v747_v15  ;;  %v39_v30 = vadd.s32 80, %v721_v1  ;;  %v40_v31 = vadd.s32 88, %v721_v1  ;;  %p659_p4 = pnand %p658_p3, %p652_p0 }
  0x10   :  { %579 = vmatpush1.bf16.msk.msra.mxu1 %vm578_vm7, %v677_v19  ;;  %vm610_vm11 = vmpackc.low %vm60_vm4, %vm58_vm3  ;;  %vm146_vm3 = vcmp.eq.s32.totalorder %v36_v23, %v745_v14  ;;  %vm143_vm7 = vcmp.eq.s32.totalorder %v35_v22, %v749_v16  ;;  %433 = vperm.xlu0 %649, %v419_v28   ;;  %v41_v32 = vadd.s32 96, %v721_v1  ;;  %v42_v33 = vadd.s32 104, %v721_v1 }
  0x11   :  { %611 = vmatpush1.bf16.msk.msra.mxu0 %vm610_vm11, %v677_v19  ;;  %vm580_vm14 = vmpackc.low %vm142_vm9, %vm140_vm6  ;;  %vm69_vm6 = vcmp.eq.s32.totalorder %v36_v23, %v747_v15  ;;  %vm66_vm11 = vcmp.eq.s32.totalorder %v35_v22, %v751_v17  ;;  %v43_v34 = vadd.s32 112, %v721_v1  ;;  %v44_v35 = vadd.s32 120, %v721_v1 }
  0x12   :  { %581 = vmatprep.subr.msk.bf16.mxu1 %vm580_vm14, %v677_v19  ;;  %vm612_vm1 = vmpackc.low %vm65_vm10, %vm63_vm8  ;;  %vm145_vm8 = vcmp.eq.s32.totalorder %v36_v23, %v749_v16  ;;  %vm148_vm14 = vcmp.eq.s32.totalorder %v37_v26, %v745_v14  ;;  %438 = vperm.xlu1 %650, %v420_v29  }
  0x13   :  { %613 = vmatprep.subr.msk.bf16.mxu0 %vm612_vm1, %v677_v19  ;;  %vm582_vm4 = vmpackc.low %vm141_vm13, %vm139_vm12  ;;  %vm68_vm12 = vcmp.eq.s32.totalorder %v36_v23, %v751_v17  ;;  %vm71_vm1 = vcmp.eq.s32.totalorder %v37_v26, %v747_v15 }
  0x14   :  { %583 = vmatpush1.bf16.msk.msra.mxu1 %vm582_vm4, %v677_v19  ;;  %vm614_vm9 = vmpackc.low %vm64_vm0, %vm62_vm15  ;;  %vm150_vm15 = vcmp.eq.s32.totalorder %v38_v27, %v745_v14  ;;  %vm147_vm4 = vcmp.eq.s32.totalorder %v37_v26, %v749_v16 }
  0x15   :  { %615 = vmatpush1.bf16.msk.msra.mxu0 %vm614_vm9, %v677_v19  ;;  %vm584_vm10 = vmpackc.low %vm146_vm3, %vm144_vm2  ;;  %vm73_vm2 = vcmp.eq.s32.totalorder %v38_v27, %v747_v15  ;;  %vm70_vm9 = vcmp.eq.s32.totalorder %v37_v26, %v751_v17 }
  0x16   :  { %585 = vmatprep.subr.msk.bf16.mxu1 %vm584_vm10, %v677_v19  ;;  %vm616_vm13 = vmpackc.low %vm69_vm6, %vm67_vm5  ;;  %vm149_vm5 = vcmp.eq.s32.totalorder %v38_v27, %v749_v16  ;;  %vm152_vm10 = vcmp.eq.s32.totalorder %v39_v30, %v745_v14 }
  0x17   :  { %617 = vmatprep.subr.msk.bf16.mxu0 %vm616_vm13, %v677_v19  ;;  %vm586_vm0 = vmpackc.low %vm145_vm8, %vm143_vm7  ;;  %vm72_vm7 = vcmp.eq.s32.totalorder %v38_v27, %v751_v17  ;;  %vm75_vm13 = vcmp.eq.s32.totalorder %v39_v30, %v747_v15 }
  0x18   :  { %587 = vmatpush1.bf16.msk.msra.mxu1 %vm586_vm0, %v677_v19  ;;  %vm618_vm3 = vmpackc.low %vm68_vm12, %vm66_vm11  ;;  %vm154_vm11 = vcmp.eq.s32.totalorder %v40_v31, %v745_v14  ;;  %vm151_vm0 = vcmp.eq.s32.totalorder %v39_v30, %v749_v16 }
  0x19   :  { %619 = vmatpush1.bf16.msk.msra.mxu0 %vm618_vm3, %v677_v19  ;;  %vm588_vm6 = vmpackc.low %vm150_vm15, %vm148_vm14  ;;  %vm77_vm14 = vcmp.eq.s32.totalorder %v40_v31, %v747_v15  ;;  %vm74_vm3 = vcmp.eq.s32.totalorder %v39_v30, %v751_v17 }
  0x1a   :  { %589 = vmatprep.subr.msk.bf16.mxu1 %vm588_vm6, %v677_v19  ;;  %vm620_vm8 = vmpackc.low %vm73_vm2, %vm71_vm1  ;;  %vm153_vm1 = vcmp.eq.s32.totalorder %v40_v31, %v749_v16  ;;  %vm76_vm6 = vcmp.eq.s32.totalorder %v40_v31, %v751_v17 }
  0x1b   :  { %621 = vmatprep.subr.msk.bf16.mxu0 %vm620_vm8, %v677_v19  ;;  %vm590_vm12 = vmpackc.low %vm149_vm5, %vm147_vm4  ;;  %vm156_vm5 = vcmp.eq.s32.totalorder %v41_v32, %v745_v14  ;;  %vm158_vm8 = vcmp.eq.s32.totalorder %v42_v33, %v745_v14 }
  0x1c   :  { %591 = vmatpush1.bf16.msk.msra.mxu1 %vm590_vm12, %v677_v19  ;;  %vm622_vm15 = vmpackc.low %vm72_vm7, %vm70_vm9  ;;  %vm79_vm7 = vcmp.eq.s32.totalorder %v41_v32, %v747_v15  ;;  %vm155_vm12 = vcmp.eq.s32.totalorder %v41_v32, %v749_v16 }
  0x1d   :  { %623 = vmatpush1.bf16.msk.msra.mxu0 %vm622_vm15, %v677_v19  ;;  %vm592_vm2 = vmpackc.low %vm154_vm11, %vm152_vm10  ;;  %vm81_vm10 = vcmp.eq.s32.totalorder %v42_v33, %v747_v15  ;;  %vm78_vm15 = vcmp.eq.s32.totalorder %v41_v32, %v751_v17 }
  0x1e   :  { %593 = vmatprep.subr.msk.bf16.mxu1 %vm592_vm2, %v677_v19  ;;  %vm624_vm4 = vmpackc.low %vm77_vm14, %vm75_vm13  ;;  %vm157_vm13 = vcmp.eq.s32.totalorder %v42_v33, %v749_v16  ;;  %vm80_vm2 = vcmp.eq.s32.totalorder %v42_v33, %v751_v17 }
  0x1f   :  { %625 = vmatprep.subr.msk.bf16.mxu0 %vm624_vm4, %v677_v19  ;;  %vm594_vm9 = vmpackc.low %vm153_vm1, %vm151_vm0  ;;  %vm160_vm1 = vcmp.eq.s32.totalorder %v43_v34, %v745_v14  ;;  %vm162_vm4 = vcmp.eq.s32.totalorder %v44_v35, %v745_v14 }
  0x20   :  { %595 = vmatpush1.bf16.msk.msra.mxu1 %vm594_vm9, %v677_v19  ;;  %vm626_vm11 = vmpackc.low %vm76_vm6, %vm74_vm3  ;;  %vm83_vm6 = vcmp.eq.s32.totalorder %v43_v34, %v747_v15  ;;  %vm85_vm9 = vcmp.eq.s32.totalorder %v44_v35, %v747_v15 }
  0x21   :  { %627 = vmatpush1.bf16.msk.msra.mxu0 %vm626_vm11, %v677_v19  ;;  %vm596_vm14 = vmpackc.low %vm158_vm8, %vm156_vm5  ;;  %vm159_vm8 = vcmp.eq.s32.totalorder %v43_v34, %v749_v16  ;;  %vm161_vm11 = vcmp.eq.s32.totalorder %v44_v35, %v749_v16 }
  0x22   :  { %597 = vmatprep.subr.msk.bf16.mxu1 %vm596_vm14, %v677_v19  ;;  %vm628_vm0 = vmpackc.low %vm81_vm10, %vm79_vm7  ;;  %vm82_vm10 = vcmp.eq.s32.totalorder %v43_v34, %v751_v17  ;;  %vm84_vm14 = vcmp.eq.s32.totalorder %v44_v35, %v751_v17 }
  0x23   :  { %629 = vmatprep.subr.msk.bf16.mxu0 %vm628_vm0, %v677_v19  ;;  %vm598_vm3 = vmpackc.low %vm157_vm13, %vm155_vm12 }
  0x24   :  { %599 = vmatpush1.bf16.msk.msra.mxu1 %vm598_vm3, %v677_v19  ;;  %vm630_vm5 = vmpackc.low %vm80_vm2, %vm78_vm15  ;;  %vm491_vm2 = vcmp.lt.s32.totalorder %v28_v0, 256 }
  0x25   :  { %631 = vmatpush1.bf16.msk.msra.mxu0 %vm630_vm5, %v677_v19  ;;  %vm600_vm7 = vmpackc.low %vm162_vm4, %vm160_vm1 }
  0x26   :  { %601 = vmatprep.subr.msk.bf16.mxu1 %vm600_vm7, %v677_v19  ;;  %vm632_vm12 = vmpackc.low %vm85_vm9, %vm83_vm6 }
  0x27   :  { %633 = vmatprep.subr.msk.bf16.mxu0 %vm632_vm12, %v677_v19  ;;  %vm602_vm13 = vmpackc.low %vm161_vm11, %vm159_vm8 }
  0x28   :  { %603 = vmatpush1.bf16.msk.msra.mxu1 %vm602_vm13, %v677_v19  ;;  %vm634_vm15 = vmpackc.low %vm84_vm14, %vm82_vm10 }
  0x29   :  { %635 = vmatpush1.bf16.msk.msra.mxu0 %vm634_vm15, %v677_v19 }
  0x2b   :  { %264 = vmatmul.mubr.f32.vlgmr.msra.gmra.mrb[0].mxu1 %v195_v36 }
  0x2c   :  { %353 = vmatmul.mubr.f32.vlgmr.msra.gmra.mrb[0].mxu0 %v118_v37  ;;  %269 = vmatprep.mubr.f32.mxu1 %v675_v2 }
  0x2d   :  { %358 = vmatprep.mubr.f32.mxu0 %v675_v2 }
  0x2f   :  { %270 = vmatmul.mubr.f32.gmra.mrb[2].mxu1 %v196_v38 }
  0x30   :  { %359 = vmatmul.mubr.f32.gmra.mrb[2].mxu0 %v119_v39  ;;  %275 = vmatprep.mubr.f32.mxu1 %v675_v2 }
  0x31   :  { %364 = vmatprep.mubr.f32.mxu0 %v675_v2 }
  0x33   :  { %276 = vmatmul.mubr.f32.gmra.mrb[4].mxu1 %v197_v40 }
  0x34   :  { %365 = vmatmul.mubr.f32.gmra.mrb[4].mxu0 %v120_v41  ;;  %281 = vmatprep.mubr.f32.mxu1 %v675_v2 }
  0x35   :  { %370 = vmatprep.mubr.f32.mxu0 %v675_v2 }
  0x37   :  { %282 = vmatmul.mubr.f32.gmra.mrb[6].mxu1 %v198_v42 }
  0x38   :  { %371 = vmatmul.mubr.f32.gmra.mrb[6].mxu0 %v121_v43 }
  0x82   :  { %v394_v45 = vpop.permute.xlu1 %393 }
  0x83   :  { %v384_v44 = vpop.permute.xlu0 %383 }
  0x86   :  { %v399_v53 = vpop.permute.xlu1 %398 }
  0x87   :  { %v389_v49 = vpop.permute.xlu0 %388 }
  0x8b   :  { %v424_v63 = vpop.permute.xlu0 %423 }
  0x8d   :  { %v429_v11 = vpop.permute.xlu1 %428 }
  0x8f   :  { %v434_v27 = vpop.permute.xlu0 %433 }
  0x91   :  { %v439_v37 = vpop.permute.xlu1 %438 }
  0xfe   :  { %v265_v46 = vpop.f32.mrb[0].mxu1 }
  0xff   :  { %v354_v47 = vpop.f32.mrb[0].mxu0  ;;  %v267_v48 = vpop.f32.mrb[1].mxu1 }
 0x100   :  { %v355_v50 = vadd.f32 %v354_v47, %v265_v46  ;;  %v356_v51 = vpop.f32.mrb[1].mxu0 }
 0x101   :  { %v357_v52 = vadd.f32 %v356_v51, %v267_v48 }
 0x102   :  { %v401_v54 = vadd.f32 %v384_v44, %v355_v50  ;;  %v271_v55 = vpop.f32.mrb[2].mxu1  ;;  %v678_v50 = vmov 1966171168  }
 0x103   :  { %v402_v56 = vadd.f32 %v384_v44, %v357_v52  ;;  %v360_v57 = vpop.f32.mrb[2].mxu0  ;;  %v273_v58 = vpop.f32.mrb[3].mxu1  ;;  %v475_v51 = vunpack.c.l.s4 %v678_v50 }
 0x104   :  { %v361_v59 = vadd.f32 %v360_v57, %v271_v55  ;;  %v362_v60 = vpop.f32.mrb[3].mxu0  ;;  %v409_v62 = vmax.f32 %v401_v54, 0.0 }
 0x105   :  { %v363_v61 = vadd.f32 %v362_v60, %v273_v58  ;;  %v410_v4 = vmax.f32 %v402_v56, 0.0  ;;  %v468_v56 = vstv %s952_s6  ;;  %v476_v57 = vunpack.c.0.s8 %v475_v51 }
 0x106   :  { %v403_v2 = vadd.f32 %v389_v49, %v361_v59  ;;  %v277_v3 = vpop.f32.mrb[4].mxu1  ;;  %v441_v14 = vmul.f32 %v424_v63, %v409_v62 }
 0x107   :  { %v404_v5 = vadd.f32 %v389_v49, %v363_v61  ;;  %v366_v6 = vpop.f32.mrb[4].mxu0  ;;  %v279_v7 = vpop.f32.mrb[5].mxu1  ;;  %v442_v18 = vmul.f32 %v424_v63, %v410_v4  ;;  %v479_v62 = vsub.s32 %v476_v57, %v721_v1 }
 0x108   :  { %v411_v8 = vmax.f32 %v403_v2, 0.0  ;;  %v367_v9 = vadd.f32 %v366_v6, %v277_v3  ;;  %v368_v10 = vpop.f32.mrb[5].mxu0 }
 0x109   :  { %v412_v12 = vmax.f32 %v404_v5, 0.0  ;;  %v369_v13 = vadd.f32 %v368_v10, %v279_v7 }
 0x10a   :  { %v443_v15 = vmul.f32 %v429_v11, %v411_v8  ;;  %v405_v16 = vadd.f32 %v394_v45, %v367_v9  ;;  %v283_v17 = vpop.f32.mrb[6].mxu1 }
 0x10b   :  { %v444_v19 = vmul.f32 %v429_v11, %v412_v12  ;;  %v406_v20 = vadd.f32 %v394_v45, %v369_v13  ;;  %v372_v21 = vpop.f32.mrb[6].mxu0  ;;  %v285_v22 = vpop.f32.mrb[7].mxu1 }
 0x10c   :  { %v449_v23 = vadd.f32 %v443_v15, %v441_v14  ;;  %v413_v24 = vmax.f32 %v405_v16, 0.0  ;;  %v373_v25 = vadd.f32 %v372_v21, %v283_v17  ;;  %v374_v26 = vpop.f32.mrb[7].mxu0 }
 0x10d   :  { %v458_v28 = vadd.f32 %v444_v19, %v442_v18  ;;  %v414_v29 = vmax.f32 %v406_v20, 0.0  ;;  %v375_v30 = vadd.f32 %v374_v26, %v285_v22 }
 0x10e   :  { %v445_v31 = vmul.f32 %v434_v27, %v413_v24  ;;  %v407_v32 = vadd.f32 %v399_v53, %v373_v25 }
 0x10f   :  { %v446_v33 = vmul.f32 %v434_v27, %v414_v29  ;;  %v408_v34 = vadd.f32 %v399_v53, %v375_v30 }
 0x110   :  { %v450_v35 = vadd.f32 %v449_v23, %v445_v31  ;;  %v415_v36 = vmax.f32 %v407_v32, 0.0 }
 0x111   :  { %v459_v38 = vadd.f32 %v458_v28, %v446_v33  ;;  %v416_v39 = vmax.f32 %v408_v34, 0.0 }
 0x112   :  { %v447_v40 = vmul.f32 %v439_v37, %v415_v36 }
 0x113   :  { %v448_v41 = vmul.f32 %v439_v37, %v416_v39 }
 0x114   :  { %v451_v42 = vadd.f32 %v450_v35, %v447_v40 }
 0x115   :  { %v460_v43 = vadd.f32 %v459_v38, %v448_v41 }
 0x116   :  { %v452_v44 = vrot.slane %v451_v42, 4 }
 0x117   :  { %v461_v45 = vrot.slane %v460_v43, 4 }
 0x118   :  { %v453_v46 = vadd.f32 %v452_v44, %v451_v42 }
 0x119   :  { %v462_v47 = vadd.f32 %v461_v45, %v460_v43 }
 0x11a   :  { %v454_v48 = vrot.slane %v453_v46, 2 }
 0x11b   :  { %v463_v49 = vrot.slane %v462_v47, 2 }
 0x11c   :  { %v455_v52 = vadd.f32 %v454_v48, %v453_v46 }
 0x11d   :  { %v464_v54 = vadd.f32 %v463_v49, %v462_v47 }
 0x11e   :  { %v456_v53 = vrot.slane %v455_v52, 1 }
 0x11f   :  { %v465_v55 = vrot.slane %v464_v54, 1 }
 0x120   :  { %v457_v58 = vadd.f32 %v456_v53, %v455_v52 }
 0x121   :  { %v466_v59 = vadd.f32 %v465_v55, %v464_v54 }
 0x122   :  { %v469_v60 = vadd.f32 %v468_v56, %v457_v58 }
 0x123   :  { %v470_v61 = vadd.f32 %v468_v56, %v466_v59 }
 0x125   :  { %v473_v63 = vcombine.low %v469_v60, %v470_v61 }
 0x127   :  { %v480_v2 = vrot.slane %v473_v63, %v479_v62 }
 0x129   :  { %v487_v3 = vrot.slane %v480_v2, %v479_v62 }
 0x12b   :  { %493 = vst.msk [vmem:[#allocation3] sm:$0x3] %vm491_vm2, %v487_v3 }
 0x12c   :  { %662 = shalt.err (!%p659_p4)
}
 0x12d   :  { %s663_s11 = scalar_lea.hbm %s953_s7, 32 }
 0x12e   :  { %p664_p5 = scmp.ne.s32.totalorder %s953_s7, %s663_s11  ;;  %p667_p6 = scmp.lt.u32.totalorder %s663_s11, %s953_s7 }
 0x130   :  { %p669_p7 = pnand %p667_p6, %p664_p5 }
 0x132   :  { %672 = shalt.err (!%p669_p7)
}
 0x133   :  { %503 = dma.vmem_to_hbm [thread:$0]  %s501_s9, 32, %s953_s7, [#allocation4]  }
 0x134   :  { %673 = dma.done.wait [#allocation4], 32  }
 0x135   :  { %674 = vsyncadd [#allocation4], 4294967264 }
 0x136   :  { %507 = vsyncpa [#allocation4], 1 }

</bundles_post_ra>
